<compile_context>
chip_gen: v7x
topology: tpu7x:2x2x1
jax: 0.10.0
libtpu: 0.0.40
codegen_flags: <defaults>
</compile_context>

<pallas_src>
import functools

import jax
import jax.numpy as jnp
from jax.experimental import pallas as pl
from jax.experimental.pallas import tpu as pltpu

SCALE = 20.0
LOSS_WEIGHT = 0.15
_EPS = 1e-12
_NEG_INF = -1e30

_VMEM_BUDGET = 40 * 1024 * 1024   # stay well under v7x's 64 MiB physical VMEM


def _round_up(x, m):
    return (x + m - 1) // m * m


def _vmem_need(block, d_pad, itemsize):
    tiles_ab = 2 * 2 * block * d_pad * itemsize      # double-buffered a & b tiles
    inv_tiles = 2 * 8 * block * 4                    # (1, block) inv_b tiles
    s_f32 = block * block * 4                        # f32 score tile (vregs / spill)
    col_scratch = 6 * block * 128 * 4                # [block,1] scratches + out (lane-padded)
    return tiles_ab + inv_tiles + s_f32 + col_scratch


def _mnr_kernel(a_ref, b_ref, invb_ref, loss_ref, m_scr, l_scr, pos_scr, rs_scr,
                *, scale, valid_b, block, mask_cols):
    qi = pl.program_id(0)
    kj = pl.program_id(1)

    @pl.when(kj == 0)
    def _init():
        # Query-tile-invariant work: done once per qi, cached in scratch.
        a32 = a_ref[...].astype(jnp.float32)
        inv_a = jax.lax.rsqrt(jnp.sum(a32 * a32, axis=-1, keepdims=True) + _EPS)
        rs_scr[...] = inv_a * scale                                   # [T,1]
        m_scr[...] = jnp.full(m_scr.shape, _NEG_INF, dtype=jnp.float32)
        l_scr[...] = jnp.zeros(l_scr.shape, dtype=jnp.float32)
        pos_scr[...] = jnp.zeros(pos_scr.shape, dtype=jnp.float32)

    # MXU: contract D of the raw (bf16) tiles with f32 accumulation, no b.T copy.
    s = jax.lax.dot_general(a_ref[...], b_ref[...], (((1,), (1,)), ((), ())),
                            preferred_element_type=jnp.float32)        # [T, T]
    # Fold cos normalization + scale: row scale (inv_a*scale) and column scale (inv_b).
    s = s * rs_scr[...] * invb_ref[...]

    if mask_cols:  # static flag: only traced when B was padded to a tile multiple
        col = kj * block + jax.lax.broadcasted_iota(jnp.int32, (1, block), 1)
        s = jnp.where(col < valid_b, s, _NEG_INF)

    # Positive (diagonal) logits live only in the kj == qi tile: read diag(s).
    @pl.when(kj == qi)
    def _pos():
        r = jax.lax.broadcasted_iota(jnp.int32, (block, 1), 0)
        c = jax.lax.broadcasted_iota(jnp.int32, (1, block), 1)
        pos_scr[...] = jnp.sum(jnp.where(r == c, s, 0.0), axis=-1, keepdims=True)

    # Streaming (online) logsumexp over key tiles.
    m_prev = m_scr[...]
    m_new = jnp.maximum(m_prev, jnp.max(s, axis=-1, keepdims=True))
    alpha = jnp.exp(m_prev - m_new)
    l_scr[...] = alpha * l_scr[...] + jnp.sum(jnp.exp(s - m_new), axis=-1,
                                              keepdims=True)
    m_scr[...] = m_new

    @pl.when(kj == pl.num_programs(1) - 1)
    def _finalize():
        # Per-row cross entropy: logsumexp_j - positive logit.
        loss_ref[...] = m_scr[...] + jnp.log(l_scr[...]) - pos_scr[...]


def mnr_loss(emb_a, emb_b, *, scale=SCALE, loss_weight=LOSS_WEIGHT,
             block_size=512):
    """MultipleNegativesRankingLoss on sentence embeddings emb_a, emb_b ([B, D])."""
    assert emb_a.shape == emb_b.shape and emb_a.ndim == 2
    B, D = emb_a.shape

    # Key-side 1/||b|| precomputed once in the wrapper (O(B*D)); the kernel keeps
    # b in its raw narrow dtype for the MXU and applies inv_b as a column scale.
    b32 = emb_b.astype(jnp.float32)
    inv_b = jax.lax.rsqrt(jnp.sum(b32 * b32, axis=-1) + _EPS)            # [B]

    d_pad = _round_up(D, 128)                 # lane-align D
    itemsize = jnp.dtype(emb_a.dtype).itemsize

    if B <= 256:
        block = _round_up(B, 16)              # single tile (bf16 sublane packing)
        b_pad = block
    else:
        # >= 2 query tiles (megacore on v7x); lane-aligned so the (1, block)
        # inv_b BlockSpec is legal; shrink until the working set fits VMEM.
        block = _round_up(min(block_size, _round_up(B, 128) // 2), 128)
        block = max(block, 128)
        while block > 128 and _vmem_need(block, d_pad, itemsize) > _VMEM_BUDGET:
            block -= 128
        b_pad = _round_up(B, block)

    if (b_pad, d_pad) != (B, D):
        emb_a = jnp.pad(emb_a, ((0, b_pad - B), (0, d_pad - D)))
        emb_b = jnp.pad(emb_b, ((0, b_pad - B), (0, d_pad - D)))
    if b_pad != B:
        inv_b = jnp.pad(inv_b, (0, b_pad - B))
    inv_b = inv_b.reshape(1, b_pad)

    n_blocks = b_pad // block
    kernel = functools.partial(_mnr_kernel, scale=scale, valid_b=B, block=block,
                               mask_cols=(b_pad != B))

    cost = pl.CostEstimate(
        flops=2 * b_pad * b_pad * d_pad,
        transcendentals=b_pad * b_pad,
        bytes_accessed=(n_blocks * b_pad * d_pad * itemsize   # b re-read per qi tile
                        + b_pad * d_pad * itemsize            # a read once
                        + n_blocks * b_pad * 4                # inv_b
                        + b_pad * 4))                         # output

    vmem_limit = int(min(max(2 * _vmem_need(block, d_pad, itemsize), 32 << 20),
                         56 << 20))

    per_row = pl.pallas_call(
        kernel,
        out_shape=jax.ShapeDtypeStruct((b_pad, 1), jnp.float32),
        grid_spec=pltpu.PrefetchScalarGridSpec(
            num_scalar_prefetch=0,
            grid=(n_blocks, n_blocks),                 # (query tiles, key tiles)
            in_specs=[
                pl.BlockSpec((block, d_pad), lambda qi, kj: (qi, 0)),   # anchors
                pl.BlockSpec((block, d_pad), lambda qi, kj: (kj, 0)),   # positives
                pl.BlockSpec((1, block), lambda qi, kj: (0, kj)),       # 1/||b||
            ],
            out_specs=pl.BlockSpec((block, 1), lambda qi, kj: (qi, 0)),
            scratch_shapes=[
                pltpu.VMEM((block, 1), jnp.float32),   # running row max  m
                pltpu.VMEM((block, 1), jnp.float32),   # running row sum  l
                pltpu.VMEM((block, 1), jnp.float32),   # positive logit
                pltpu.VMEM((block, 1), jnp.float32),   # inv_a * scale (hoisted)
            ],
        ),
        compiler_params=pltpu.CompilerParams(
            dimension_semantics=("parallel", "arbitrary"),
            vmem_limit_bytes=vmem_limit),
        cost_estimate=cost,
    )(emb_a, emb_b, inv_b)

    return jnp.mean(per_row[:B, 0]) * loss_weight


def encode_sentences(token_ids, attention_mask, emb_table):
    """Stand-in for SentenceTransformer first module (word emb) + last module (mean pooling)."""
    word_embs = emb_table[token_ids]                                    # [B, L, D]
    mask = attention_mask[..., None].astype(jnp.float32)                # [B, L, 1]
    summed = jnp.sum(word_embs * mask, axis=1)                          # [B, D]
    counts = jnp.clip(jnp.sum(mask, axis=1), 1e-9, None)                # [B, 1]
    return summed / counts


def reference_loss(emb_a, emb_b, scale=SCALE, loss_weight=LOSS_WEIGHT):
    a = emb_a.astype(jnp.float32)
    b = emb_b.astype(jnp.float32)
    a_n = a / jnp.linalg.norm(a, axis=-1, keepdims=True)
    b_n = b / jnp.linalg.norm(b, axis=-1, keepdims=True)
    scores = (a_n @ b_n.T) * scale
    n = scores.shape[0]
    logp = jax.nn.log_softmax(scores, axis=-1)
    ce = -jnp.mean(logp[jnp.arange(n), jnp.arange(n)])
    return ce * loss_weight


if __name__ == "__main__":
    key = jax.random.PRNGKey(0)
    L, D, V = 16, 256, 1000                      # seq-len, hidden, vocab
    k_emb = jax.random.fold_in(key, 1)
    emb_table = jax.random.normal(k_emb, (V, D), dtype=jnp.float32) * 0.1

    # Three configs: exact single tile, padded single tile (mask path), and a
    # multi-tile batch that exercises streaming key tiles + blocked inv_b + mask.
    for B, blk in ((64, 512), (60, 512), (300, 128)):
        k_a, k_b = jax.random.split(jax.random.fold_in(key, B))
        tok_a = jax.random.randint(k_a, (B, L), 0, V)
        tok_b = jax.random.randint(k_b, (B, L), 0, V)
        attn = jnp.ones((B, L), dtype=jnp.int32)

        # "sentence_features" -> sentence embeddings; keep them bf16 in HBM.
        emb_a = encode_sentences(tok_a, attn, emb_table).astype(jnp.bfloat16)
        emb_b = encode_sentences(tok_b, attn, emb_table).astype(jnp.bfloat16)

        loss = jax.block_until_ready(mnr_loss(emb_a, emb_b, block_size=blk))
        ref = reference_loss(emb_a, emb_b)
        assert jnp.allclose(loss, ref, rtol=1e-2, atol=1e-3), (B, loss, ref)

    print("KERNEL_OK")
</pallas_src>

<mosaic_0001>
module attributes {stable_mosaic.version = 11 : i64} {
  func.func @_mnr_kernel(%arg0: i32, %arg1: i32, %arg2: memref<64x256xbf16, #tpu.memory_space<vmem>>, %arg3: memref<64x256xbf16, #tpu.memory_space<vmem>>, %arg4: memref<1x64xf32, #tpu.memory_space<vmem>>, %arg5: memref<64x1xf32, #tpu.memory_space<vmem>>, %arg6: memref<64x1xf32, #tpu.memory_space<vmem>>, %arg7: memref<64x1xf32, #tpu.memory_space<vmem>>, %arg8: memref<64x1xf32, #tpu.memory_space<vmem>>, %arg9: memref<64x1xf32, #tpu.memory_space<vmem>>) attributes {dimension_semantics = [#tpu.dimension_semantics<parallel>, #tpu.dimension_semantics<arbitrary>], iteration_bounds = array<i64: 1, 1>, scalar_prefetch = 0 : i64, scratch_operands = 4 : i64, tpu.core_type = #tpu.core_type<tc>, window_params = [{transform_indices = @transform_0, window_bounds = array<i64: 64, 256>}, {transform_indices = @transform_1, window_bounds = array<i64: 64, 256>}, {transform_indices = @transform_2, window_bounds = array<i64: 1, 64>}, {transform_indices = @transform_3, window_bounds = array<i64: 64, 1>}]} {
    %c0_i32 = arith.constant 0 : i32
    %0 = arith.cmpi eq, %arg1, %c0_i32 : i32
    %1 = arith.extui %0 : i1 to i32
    %c0_i32_0 = arith.constant 0 : i32
    %2 = arith.cmpi ne, %1, %c0_i32_0 : i32
    scf.if %2 {
      %c0_21 = arith.constant 0 : index
      %c0_22 = arith.constant 0 : index
      %34 = vector.load %arg2[%c0_21, %c0_22] : memref<64x256xbf16, #tpu.memory_space<vmem>>, vector<64x256xbf16>
      %35 = arith.extf %34 : vector<64x256xbf16> to vector<64x256xf32>
      %36 = arith.mulf %35, %35 : vector<64x256xf32>
      %cst_23 = arith.constant dense<0.000000e+00> : vector<64xf32>
      %37 = vector.multi_reduction <add>, %36, %cst_23 [1] : vector<64x256xf32> to vector<64xf32>
      %38 = vector.shape_cast %37 : vector<64xf32> to vector<64x1xf32>
      %cst_24 = arith.constant 9.99999996E-13 : f32
      %39 = vector.broadcast %cst_24 : f32 to vector<64x1xf32>
      %40 = arith.addf %38, %39 : vector<64x1xf32>
      %41 = math.rsqrt %40 : vector<64x1xf32>
      %cst_25 = arith.constant 2.000000e+01 : f32
      %42 = vector.broadcast %cst_25 : f32 to vector<64x1xf32>
      %43 = arith.mulf %41, %42 : vector<64x1xf32>
      %c0_26 = arith.constant 0 : index
      %c0_27 = arith.constant 0 : index
      %44 = vector.load %arg9[%c0_26, %c0_27] : memref<64x1xf32, #tpu.memory_space<vmem>>, vector<64x1xf32>
      tpu.vector_store %arg9[%c0_26, %c0_27], %43 {strides = array<i32>} : memref<64x1xf32, #tpu.memory_space<vmem>>, vector<64x1xf32>,
      %cst_28 = arith.constant -1.000000e+30 : f32
      %45 = vector.broadcast %cst_28 : f32 to vector<64x1xf32>
      %c0_29 = arith.constant 0 : index
      %c0_30 = arith.constant 0 : index
      %46 = vector.load %arg6[%c0_29, %c0_30] : memref<64x1xf32, #tpu.memory_space<vmem>>, vector<64x1xf32>
      tpu.vector_store %arg6[%c0_29, %c0_30], %45 {strides = array<i32>} : memref<64x1xf32, #tpu.memory_space<vmem>>, vector<64x1xf32>,
      %cst_31 = arith.constant 0.000000e+00 : f32
      %47 = vector.broadcast %cst_31 : f32 to vector<64x1xf32>
      %c0_32 = arith.constant 0 : index
      %c0_33 = arith.constant 0 : index
      %48 = vector.load %arg7[%c0_32, %c0_33] : memref<64x1xf32, #tpu.memory_space<vmem>>, vector<64x1xf32>
      tpu.vector_store %arg7[%c0_32, %c0_33], %47 {strides = array<i32>} : memref<64x1xf32, #tpu.memory_space<vmem>>, vector<64x1xf32>,
      %cst_34 = arith.constant 0.000000e+00 : f32
      %49 = vector.broadcast %cst_34 : f32 to vector<64x1xf32>
      %c0_35 = arith.constant 0 : index
      %c0_36 = arith.constant 0 : index
      %50 = vector.load %arg8[%c0_35, %c0_36] : memref<64x1xf32, #tpu.memory_space<vmem>>, vector<64x1xf32>
      tpu.vector_store %arg8[%c0_35, %c0_36], %49 {strides = array<i32>} : memref<64x1xf32, #tpu.memory_space<vmem>>, vector<64x1xf32>,
    } else {
    }
    %c0 = arith.constant 0 : index
    %c0_1 = arith.constant 0 : index
    %3 = vector.load %arg2[%c0, %c0_1] : memref<64x256xbf16, #tpu.memory_space<vmem>>, vector<64x256xbf16>
    %c0_2 = arith.constant 0 : index
    %c0_3 = arith.constant 0 : index
    %4 = vector.load %arg3[%c0_2, %c0_3] : memref<64x256xbf16, #tpu.memory_space<vmem>>, vector<64x256xbf16>
    %cst = arith.constant dense<0.000000e+00> : vector<64x64xf32>
    %5 = tpu.matmul %3, %4, %cst {dimension_numbers = #tpu.dot_dimension_numbers<[1], [1], [0], [0], [0, 0, 1, 0], [], []>} : vector<64x256xbf16>, vector<64x256xbf16>, vector<64x64xf32> -> vector<64x64xf32>
    %c0_4 = arith.constant 0 : index
    %c0_5 = arith.constant 0 : index
    %6 = vector.load %arg9[%c0_4, %c0_5] : memref<64x1xf32, #tpu.memory_space<vmem>>, vector<64x1xf32>
    %7 = vector.broadcast %6 : vector<64x1xf32> to vector<64x64xf32>
    %8 = arith.mulf %5, %7 : vector<64x64xf32>
    %c0_6 = arith.constant 0 : index
    %c0_7 = arith.constant 0 : index
    %9 = vector.load %arg4[%c0_6, %c0_7] : memref<1x64xf32, #tpu.memory_space<vmem>>, vector<1x64xf32>
    %10 = vector.broadcast %9 : vector<1x64xf32> to vector<64x64xf32>
    %11 = arith.mulf %8, %10 : vector<64x64xf32>
    %12 = arith.cmpi eq, %arg1, %arg0 : i32
    %13 = arith.extui %12 : i1 to i32
    %c0_i32_8 = arith.constant 0 : i32
    %14 = arith.cmpi ne, %13, %c0_i32_8 : i32
    scf.if %14 {
      %34 = tpu.iota {dimensions = array<i32: 0>} : vector<64x1xi32>
      %35 = tpu.iota {dimensions = array<i32: 1>} : vector<1x64xi32>
      %36 = vector.broadcast %34 : vector<64x1xi32> to vector<64x64xi32>
      %37 = vector.broadcast %35 : vector<1x64xi32> to vector<64x64xi32>
      %38 = arith.cmpi eq, %36, %37 : vector<64x64xi32>
      %cst_21 = arith.constant 0.000000e+00 : f32
      %39 = vector.broadcast %cst_21 : f32 to vector<64x64xf32>
      %40 = arith.select %38, %11, %39 : vector<64x64xi1>, vector<64x64xf32>
      %cst_22 = arith.constant dense<0.000000e+00> : vector<64xf32>
      %41 = vector.multi_reduction <add>, %40, %cst_22 [1] : vector<64x64xf32> to vector<64xf32>
      %42 = vector.shape_cast %41 : vector<64xf32> to vector<64x1xf32>
      %c0_23 = arith.constant 0 : index
      %c0_24 = arith.constant 0 : index
      %43 = vector.load %arg8[%c0_23, %c0_24] : memref<64x1xf32, #tpu.memory_space<vmem>>, vector<64x1xf32>
      tpu.vector_store %arg8[%c0_23, %c0_24], %42 {strides = array<i32>} : memref<64x1xf32, #tpu.memory_space<vmem>>, vector<64x1xf32>,
    } else {
    }
    %c0_9 = arith.constant 0 : index
    %c0_10 = arith.constant 0 : index
    %15 = vector.load %arg6[%c0_9, %c0_10] : memref<64x1xf32, #tpu.memory_space<vmem>>, vector<64x1xf32>
    %cst_11 = arith.constant dense<0xFF800000> : vector<64xf32>
    %16 = vector.multi_reduction <maximumf>, %11, %cst_11 [1] : vector<64x64xf32> to vector<64xf32>
    %17 = vector.shape_cast %16 : vector<64xf32> to vector<64x1xf32>
    %18 = arith.maximumf %15, %17 : vector<64x1xf32>
    %19 = arith.subf %15, %18 : vector<64x1xf32>
    %20 = math.exp %19 : vector<64x1xf32>
    %c0_12 = arith.constant 0 : index
    %c0_13 = arith.constant 0 : index
    %21 = vector.load %arg7[%c0_12, %c0_13] : memref<64x1xf32, #tpu.memory_space<vmem>>, vector<64x1xf32>
    %22 = arith.mulf %20, %21 : vector<64x1xf32>
    %23 = vector.broadcast %18 : vector<64x1xf32> to vector<64x64xf32>
    %24 = arith.subf %11, %23 : vector<64x64xf32>
    %25 = math.exp %24 : vector<64x64xf32>
    %cst_14 = arith.constant dense<0.000000e+00> : vector<64xf32>
    %26 = vector.multi_reduction <add>, %25, %cst_14 [1] : vector<64x64xf32> to vector<64xf32>
    %27 = vector.shape_cast %26 : vector<64xf32> to vector<64x1xf32>
    %28 = arith.addf %22, %27 : vector<64x1xf32>
    %c0_15 = arith.constant 0 : index
    %c0_16 = arith.constant 0 : index
    %29 = vector.load %arg7[%c0_15, %c0_16] : memref<64x1xf32, #tpu.memory_space<vmem>>, vector<64x1xf32>
    tpu.vector_store %arg7[%c0_15, %c0_16], %28 {strides = array<i32>} : memref<64x1xf32, #tpu.memory_space<vmem>>, vector<64x1xf32>,
    %c0_17 = arith.constant 0 : index
    %c0_18 = arith.constant 0 : index
    %30 = vector.load %arg6[%c0_17, %c0_18] : memref<64x1xf32, #tpu.memory_space<vmem>>, vector<64x1xf32>
    tpu.vector_store %arg6[%c0_17, %c0_18], %18 {strides = array<i32>} : memref<64x1xf32, #tpu.memory_space<vmem>>, vector<64x1xf32>,
    %c0_i32_19 = arith.constant 0 : i32
    %31 = arith.cmpi eq, %arg1, %c0_i32_19 : i32
    %32 = arith.extui %31 : i1 to i32
    %c0_i32_20 = arith.constant 0 : i32
    %33 = arith.cmpi ne, %32, %c0_i32_20 : i32
    scf.if %33 {
      %c0_21 = arith.constant 0 : index
      %c0_22 = arith.constant 0 : index
      %34 = vector.load %arg6[%c0_21, %c0_22] : memref<64x1xf32, #tpu.memory_space<vmem>>, vector<64x1xf32>
      %c0_23 = arith.constant 0 : index
      %c0_24 = arith.constant 0 : index
      %35 = vector.load %arg7[%c0_23, %c0_24] : memref<64x1xf32, #tpu.memory_space<vmem>>, vector<64x1xf32>
      %36 = math.log %35 : vector<64x1xf32>
      %37 = arith.addf %34, %36 : vector<64x1xf32>
      %c0_25 = arith.constant 0 : index
      %c0_26 = arith.constant 0 : index
      %38 = vector.load %arg8[%c0_25, %c0_26] : memref<64x1xf32, #tpu.memory_space<vmem>>, vector<64x1xf32>
      %39 = arith.subf %37, %38 : vector<64x1xf32>
      %c0_27 = arith.constant 0 : index
      %c0_28 = arith.constant 0 : index
      %40 = vector.load %arg5[%c0_27, %c0_28] : memref<64x1xf32, #tpu.memory_space<vmem>>, vector<64x1xf32>
      tpu.vector_store %arg5[%c0_27, %c0_28], %39 {strides = array<i32>} : memref<64x1xf32, #tpu.memory_space<vmem>>, vector<64x1xf32>,
    } else {
    }
    return
  }
  func.func @transform_0(%arg0: i32, %arg1: i32) -> (i32, i32) {
    %c0_i32 = arith.constant 0 : i32
    %c0_i32_0 = arith.constant 0 : i32
    return %arg0, %c0_i32 : i32, i32
  }
  func.func @transform_1(%arg0: i32, %arg1: i32) -> (i32, i32) {
    %c0_i32 = arith.constant 0 : i32
    %c0_i32_0 = arith.constant 0 : i32
    return %arg1, %c0_i32 : i32, i32
  }
  func.func @transform_2(%arg0: i32, %arg1: i32) -> (i32, i32) {
    %c0_i32 = arith.constant 0 : i32
    %c0_i32_0 = arith.constant 0 : i32
    return %c0_i32, %arg1 : i32, i32
  }
  func.func @transform_3(%arg0: i32, %arg1: i32) -> (i32, i32) {
    %c0_i32 = arith.constant 0 : i32
    %c0_i32_0 = arith.constant 0 : i32
    return %arg0, %c0_i32 : i32, i32
  }
}

</mosaic_0001>

<bundles_post_ra>
// kernel: tpu_custom_call.1
= control target key start
LH: loop header
LB: loop body
LE: loop exit
PB: predicated region body
PF: predicated region fallthrough
CT: control target
= control target key end

     0   :  { %8 = vsyncpa [#allocation7], 0  ;;  %s1248_s0 = inlined_call_operand.hbm [shape: bf16[64,256], index: 0, kind: input, shape index: {}]   ;;  %s1249_s1 = inlined_call_operand.hbm [shape: bf16[64,256], index: 1, kind: input, shape index: {}]   ;;  %s1250_s2 = inlined_call_operand.vmem [shape: f32[1,64], index: 2, kind: input, shape index: {}]   ;;  %s1251_s3 = inlined_call_operand.vmem [shape: f32[64,1], index: 3, kind: output, shape index: {}]  }
   0x1   :  { %9 = vsyncpa [#allocation9], 0  ;;  %s898_s12 = smov [#allocation6]   ;;  %s850_s16 = scalar_lea.hbm %s1248_s0, 1024 }
   0x2   :  { %s15_s13 = sshll.u32 %s898_s12, 4  ;;  %p851_p0 = scmp.ne.s32.totalorder %s1248_s0, %s850_s16  ;;  %s16_s13 = int_to_ptr.vmem [resolvable:$true] %s15_s13 }
   0x3   :  { %p854_p1 = scmp.lt.u32.totalorder %s850_s16, %s1248_s0 }
   0x5   :  { %p856_p2 = pnand %p854_p1, %p851_p0 }
   0x7   :  { %859 = shalt.err (!%p856_p2)
}
   0x8   :  { %s860_s21 = scalar_lea.vmem %s16_s13, 1024  ;;  %p865_p4 = scmp.lt.s32.totalorder %s16_s13, %s16_s13 }
   0x9   :  { %p861_p3 = scmp.ne.s32.totalorder %s16_s13, %s860_s21  ;;  %p866_p5 = scmp.lt.s32.totalorder %s860_s21, %s860_s21 }
   0xb   :  { %p867_p6 = por %p866_p5, %p865_p4 }
   0xd   :  { %p868_p7 = pnand %p867_p6, %p861_p3 }
   0xf   :  { %871 = shalt.err (!%p868_p7)
}
  0x10   :  { %s899_s22 = smov 128   ;;  %s900_s23 = smov 8  }
  0x11   :  { %21 = dma.hbm_to_vmem [thread:$0]  %s1248_s0, 1024, %s16_s13, [#allocation7], %s899_s22, %s899_s22, %s900_s23  }
  0x12   :  { %s901_s26 = smov [#allocation8]   ;;  %s872_s30 = scalar_lea.hbm %s1249_s1, 1024 }
  0x13   :  { %s27_s27 = sshll.u32 %s901_s26, 4  ;;  %p873_p8 = scmp.ne.s32.totalorder %s1249_s1, %s872_s30  ;;  %s28_s27 = int_to_ptr.vmem [resolvable:$true] %s27_s27 }
  0x14   :  { %p876_p9 = scmp.lt.u32.totalorder %s872_s30, %s1249_s1 }
  0x16   :  { %p878_p10 = pnand %p876_p9, %p873_p8 }
  0x18   :  { %881 = shalt.err (!%p878_p10)
}
  0x19   :  { %s882_s8 = scalar_lea.vmem %s28_s27, 1024  ;;  %p887_p12 = scmp.lt.s32.totalorder %s28_s27, %s28_s27 }
  0x1a   :  { %p883_p11 = scmp.ne.s32.totalorder %s28_s27, %s882_s8  ;;  %p888_p13 = scmp.lt.s32.totalorder %s882_s8, %s882_s8 }
  0x1c   :  { %p889_p0 = por %p888_p13, %p887_p12 }
  0x1e   :  { %p890_p1 = pnand %p889_p0, %p883_p11 }
  0x20   :  { %893 = shalt.err (!%p890_p1)
}
  0x21   :  { %33 = dma.hbm_to_vmem [thread:$0]  %s1249_s1, 1024, %s28_s27, [#allocation9], %s899_s22, %s899_s22, %s900_s23  }
  0x22   :  { %894 = dma.done.wait [#allocation7], 1024  }
  0x23   :  { %895 = vsyncadd [#allocation7], 4294966272 }
  0x24   :  { %896 = dma.done.wait [#allocation9], 1024  }
  0x25   :  { %897 = vsyncadd [#allocation9], 4294966272  ;;  %v949_v0 = vld [vmem:[#allocation6] sm:$0xff]  ;;  %v951_v1 = vld [vmem:[#allocation6 + $0x8] sm:$0xff]  ;;  %vm135_vm0 = vcmask 7168   ;;  %vm431_vm1 = vcmask 523264  }
  0x26   :  { %v953_v2 = vld [vmem:[#allocation6 + $0x10] sm:$0xff]  ;;  %v55_v3 = vunpack.c.l.bf16 %v949_v0  ;;  %v56_v4 = vunpack.c.h.bf16 %v949_v0  ;;  %v57_v5 = vunpack.c.l.bf16 %v951_v1  ;;  %v58_v6 = vunpack.c.h.bf16 %v951_v1  ;;  %v959_v7 = vld [vmem:[#allocation6 + $0x18] sm:$0xff]  ;;  %v961_v8 = vld [vmem:[#allocation6 + $0x20] sm:$0xff] }
  0x27   :  { %v59_v9 = vunpack.c.l.bf16 %v953_v2  ;;  %v60_v10 = vunpack.c.h.bf16 %v953_v2  ;;  %v61_v11 = vunpack.c.l.bf16 %v959_v7  ;;  %v62_v12 = vunpack.c.h.bf16 %v959_v7  ;;  %v967_v13 = vld [vmem:[#allocation6 + $0x28] sm:$0xff]  ;;  %v969_v14 = vld [vmem:[#allocation6 + $0x30] sm:$0xff]  ;;  %v973_v30 = vld [vmem:[#allocation6 + $0x38] sm:$0xff] }
  0x28   :  { %v71_v15 = vmul.f32 %v55_v3, %v55_v3  ;;  %v72_v16 = vmul.f32 %v56_v4, %v56_v4  ;;  %v73_v17 = vmul.f32 %v57_v5, %v57_v5  ;;  %v74_v18 = vmul.f32 %v58_v6, %v58_v6  ;;  %v766_v19 = vld [vmem:[#allocation8 + $0x4] ss:$8 sps:$4 sm:$0xff]   ;;  %v768_v20 = vld [vmem:[#allocation8] ss:$8 sps:$4 sm:$0xff]   ;;  %v769_v25 = vld [vmem:[#allocation8 + $0x14] ss:$8 sps:$4 sm:$0xff]  }
  0x29   :  { %v75_v21 = vmul.f32 %v59_v9, %v59_v9  ;;  %v76_v22 = vmul.f32 %v60_v10, %v60_v10  ;;  %v77_v23 = vmul.f32 %v61_v11, %v61_v11  ;;  %v78_v24 = vmul.f32 %v62_v12, %v62_v12  ;;  %264 = vmatprep.subr.bf16.mxu0 %v766_v19  ;;  %v771_v43 = vld [vmem:[#allocation8 + $0x10] ss:$8 sps:$4 sm:$0xff]   ;;  %v772_v48 = vld [vmem:[#allocation8 + $0x24] ss:$8 sps:$4 sm:$0xff]   ;;  %v774_v55 = vld [vmem:[#allocation8 + $0x20] ss:$8 sps:$4 sm:$0xff]  }
  0x2a   :  { %v87_v26 = vadd.f32 %v72_v16, %v71_v15  ;;  %v90_v27 = vadd.f32 %v74_v18, %v73_v17  ;;  %v63_v28 = vunpack.c.l.bf16 %v961_v8  ;;  %v64_v29 = vunpack.c.h.bf16 %v961_v8  ;;  %749 = vmatprep.subr.bf16.mxu1 %v766_v19  ;;  %265 = vmatpush1.bf16.xpose.msra.mxu0 %v768_v20  ;;  %v775_v56 = vld [vmem:[#allocation8 + $0x34] ss:$8 sps:$4 sm:$0xff]   ;;  %v777_v57 = vld [vmem:[#allocation8 + $0x30] ss:$8 sps:$4 sm:$0xff]  }
  0x2b   :  { %v93_v31 = vadd.f32 %v76_v22, %v75_v21  ;;  %v96_v32 = vadd.f32 %v78_v24, %v77_v23  ;;  %v65_v33 = vunpack.c.l.bf16 %v967_v13  ;;  %v66_v34 = vunpack.c.h.bf16 %v967_v13  ;;  %753 = vmatpush1.bf16.xpose.msra.mxu1 %v768_v20  ;;  %266 = vmatprep.subr.bf16.mxu0 %v769_v25 }
  0x2c   :  { %88 = vadd.xlane.f32.xlu0 %v87_v26  ;;  %v79_v35 = vmul.f32 %v63_v28, %v63_v28  ;;  %v80_v36 = vmul.f32 %v64_v29, %v64_v29  ;;  %v67_v37 = vunpack.c.l.bf16 %v969_v14  ;;  %v68_v38 = vunpack.c.h.bf16 %v969_v14  ;;  %750 = vmatprep.subr.bf16.mxu1 %v769_v25 }
  0x2d   :  { %94 = vadd.xlane.f32.xlu1 %v93_v31  ;;  %v81_v39 = vmul.f32 %v65_v33, %v65_v33  ;;  %v82_v40 = vmul.f32 %v66_v34, %v66_v34  ;;  %v69_v41 = vunpack.c.l.bf16 %v973_v30  ;;  %v70_v42 = vunpack.c.h.bf16 %v973_v30 }
  0x2e   :  { %v733_v44 = vcombine.high %v949_v0, %v951_v1  ;;  %v99_v45 = vadd.f32 %v80_v36, %v79_v35  ;;  %v83_v46 = vmul.f32 %v67_v37, %v67_v37  ;;  %v84_v47 = vmul.f32 %v68_v38, %v68_v38 }
  0x2f   :  { %v102_v49 = vadd.f32 %v82_v40, %v81_v39  ;;  %v85_v50 = vmul.f32 %v69_v41, %v69_v41  ;;  %v86_v51 = vmul.f32 %v70_v42, %v70_v42  ;;  %v737_v52 = vcombine.high %v961_v8, %v967_v13 }
  0x30   :  { %91 = vadd.xlane.f32.xlu0 %v90_v27  ;;  %296 = vmatprep.mubr.bf16.mxu0 %v733_v44  ;;  %v105_v53 = vadd.f32 %v84_v47, %v83_v46  ;;  %v732_v58 = vcombine.low %v949_v0, %v951_v1  ;;  %v736_v59 = vcombine.low %v961_v8, %v967_v13  ;;  %v902_v0 = vmov 0  }
  0x31   :  { %97 = vadd.xlane.f32.xlu1 %v96_v32  ;;  %v108_v54 = vadd.f32 %v86_v51, %v85_v50  ;;  %312 = vmatprep.mubr.bf16.mxu1 %v737_v52  ;;  %v735_v60 = vcombine.high %v953_v2, %v959_v7  ;;  %v739_v61 = vcombine.high %v969_v14, %v973_v30  ;;  %v903_v41 = vmov -1e+30  }
  0x32   :  { %267 = vmatpush1.bf16.xpose.msra.mxu0 %v771_v43  ;;  %v734_v62 = vcombine.low %v953_v2, %v959_v7  ;;  %v738_v63 = vcombine.low %v969_v14, %v973_v30  ;;  %764 = vset.pattern.permute.xlu0 %v902_v0  ;;  %144 = vst.msk [vmem:[#allocation2] sm:$0xff] %vm135_vm0, %v903_v41  ;;  %145 = vst.msk [vmem:[#allocation2 + $0x8] sm:$0xff] %vm135_vm0, %v903_v41 }
  0x33   :  { %754 = vmatpush1.bf16.xpose.msra.mxu1 %v771_v43  ;;  %268 = vmatprep.subr.bf16.mxu0 %v772_v48  ;;  %146 = vst.msk [vmem:[#allocation2 + $0x10] sm:$0xff] %vm135_vm0, %v903_v41  ;;  %147 = vst.msk [vmem:[#allocation2 + $0x18] sm:$0xff] %vm135_vm0, %v903_v41 }
  0x34   :  { %100 = vadd.xlane.f32.xlu0 %v99_v45  ;;  %751 = vmatprep.subr.bf16.mxu1 %v772_v48  ;;  %148 = vst.msk [vmem:[#allocation2 + $0x20] sm:$0xff] %vm135_vm0, %v903_v41  ;;  %149 = vst.msk [vmem:[#allocation2 + $0x28] sm:$0xff] %vm135_vm0, %v903_v41 }
  0x35   :  { %103 = vadd.xlane.f32.xlu1 %v102_v49  ;;  %150 = vst.msk [vmem:[#allocation2 + $0x30] sm:$0xff] %vm135_vm0, %v903_v41  ;;  %151 = vst.msk [vmem:[#allocation2 + $0x38] sm:$0xff] %vm135_vm0, %v903_v41 }
  0x36   :  { %765 = vset.pattern.permute.xlu1 %v902_v0 }
  0x38   :  { %106 = vadd.xlane.f32.xlu0 %v105_v53 }
  0x39   :  { %109 = vadd.xlane.f32.xlu1 %v108_v54 }
  0x3a   :  { %269 = vmatpush1.bf16.xpose.msra.mxu0 %v774_v55 }
  0x3b   :  { %755 = vmatpush1.bf16.xpose.msra.mxu1 %v774_v55  ;;  %270 = vmatprep.subr.bf16.mxu0 %v775_v56 }
  0x3c   :  { %752 = vmatprep.subr.bf16.mxu1 %v775_v56 }
  0x42   :  { %271 = vmatpush1.bf16.xpose.msra.mxu0 %v777_v57 }
  0x43   :  { %756 = vmatpush1.bf16.xpose.msra.mxu1 %v777_v57 }
  0x49   :  { %297 = vmatmul.mubr.bf16.vlgmr.msra.gmra.mrb[0].mxu0 %v732_v58  ;;  %v748_v58 = vld [vmem:[%s1250_s2] ss:$0 sm:$0xff] }
  0x4a   :  { %313 = vmatmul.mubr.bf16.vlgmr.msra.gmra.mrb[0].mxu1 %v736_v59  ;;  %304 = vmatprep.mubr.bf16.mxu0 %v735_v60 }
  0x4b   :  { %320 = vmatprep.mubr.bf16.mxu1 %v739_v61 }
  0x51   :  { %305 = vmatmul.mubr.bf16.gmra.mrb[4].mxu0 %v734_v62 }
  0x52   :  { %321 = vmatmul.mubr.bf16.gmra.mrb[4].mxu1 %v738_v63 }
  0xb9   :  { %v89_v1 = vpop.xlane.xlu0 %88 }
  0xba   :  { %v111_v3 = vadd.f32 1e-12, %v89_v1  ;;  %v95_v4 = vpop.xlane.xlu1 %94 }
  0xbb   :  { %v113_v5 = vadd.f32 1e-12, %v95_v4 }
  0xbc   :  { %786 = vrsqrt.f32 %v111_v3 }
  0xbd   :  { %v92_v6 = vpop.xlane.xlu0 %91  ;;  %788 = vrsqrt.f32 %v113_v5 }
  0xbe   :  { %v112_v8 = vadd.f32 1e-12, %v92_v6  ;;  %v98_v9 = vpop.xlane.xlu1 %97 }
  0xbf   :  { %v114_v10 = vadd.f32 1e-12, %v98_v9 }
  0xc0   :  { %790 = vrsqrt.f32 %v112_v8 }
  0xc1   :  { %792 = vrsqrt.f32 %v114_v10  ;;  %v101_v2 = vpop.xlane.xlu0 %100 }
  0xc2   :  { %v115_v7 = vadd.f32 1e-12, %v101_v2  ;;  %v104_v11 = vpop.xlane.xlu1 %103 }
  0xc3   :  { %v116_v12 = vadd.f32 1e-12, %v104_v11 }
  0xc4   :  { %794 = vrsqrt.f32 %v115_v7 }
  0xc5   :  { %796 = vrsqrt.f32 %v116_v12  ;;  %v107_v13 = vpop.xlane.xlu0 %106 }
  0xc6   :  { %v787_v14 = vpop.eup %786  ;;  %v117_v15 = vadd.f32 1e-12, %v107_v13  ;;  %v110_v16 = vpop.xlane.xlu1 %109 }
  0xc7   :  { %v789_v17 = vpop.eup %788  ;;  %v127_v18 = vmul.f32 20.0, %v787_v14  ;;  %v118_v19 = vadd.f32 1e-12, %v110_v16 }
  0xc8   :  { %v129_v20 = vmul.f32 20.0, %v789_v17  ;;  %798 = vrsqrt.f32 %v117_v15 }
  0xc9   :  { %136 = vst.msk [vmem:[#allocation5] sm:$0xff] %vm135_vm0, %v127_v18  ;;  %800 = vrsqrt.f32 %v118_v19 }
  0xca   :  { %v791_v21 = vpop.eup %790  ;;  %138 = vst.msk [vmem:[#allocation5 + $0x10] sm:$0xff] %vm135_vm0, %v129_v20 }
  0xcb   :  { %v793_v22 = vpop.eup %792  ;;  %v128_v23 = vmul.f32 20.0, %v791_v21 }
  0xcc   :  { %v130_v24 = vmul.f32 20.0, %v793_v22 }
  0xcd   :  { %137 = vst.msk [vmem:[#allocation5 + $0x8] sm:$0xff] %vm135_vm0, %v128_v23 }
  0xce   :  { %v795_v25 = vpop.eup %794  ;;  %139 = vst.msk [vmem:[#allocation5 + $0x18] sm:$0xff] %vm135_vm0, %v130_v24 }
  0xcf   :  { %v797_v26 = vpop.eup %796  ;;  %v131_v27 = vmul.f32 20.0, %v795_v25  ;;  %v904_v25 = vmov 0.0  }
  0xd0   :  { %v132_v28 = vmul.f32 20.0, %v797_v26  ;;  %v329_v29 = vld [vmem:[#allocation5] sm:$0xff]  ;;  %152 = vst.msk [vmem:[#allocation3] sm:$0xff] %vm135_vm0, %v904_v25  ;;  %153 = vst.msk [vmem:[#allocation3 + $0x8] sm:$0xff] %vm135_vm0, %v904_v25 }
  0xd1   :  { %140 = vst.msk [vmem:[#allocation5 + $0x20] sm:$0xff] %vm135_vm0, %v131_v27  ;;  %339 = vperm.xlu0 %764, %v329_v29   ;;  %v331_v35 = vld [vmem:[#allocation5 + $0x10] sm:$0xff]  ;;  %154 = vst.msk [vmem:[#allocation3 + $0x10] sm:$0xff] %vm135_vm0, %v904_v25 }
  0xd2   :  { %v799_v30 = vpop.eup %798  ;;  %141 = vst.msk [vmem:[#allocation5 + $0x28] sm:$0xff] %vm135_vm0, %v132_v28  ;;  %155 = vst.msk [vmem:[#allocation3 + $0x18] sm:$0xff] %vm135_vm0, %v904_v25  ;;  %v1064_v28 = vld [vmem:[#allocation2] sm:$0xff] }
  0xd3   :  { %v801_v31 = vpop.eup %800  ;;  %v133_v32 = vmul.f32 20.0, %v799_v30  ;;  %156 = vst.msk [vmem:[#allocation3 + $0x20] sm:$0xff] %vm135_vm0, %v904_v25  ;;  %157 = vst.msk [vmem:[#allocation3 + $0x28] sm:$0xff] %vm135_vm0, %v904_v25 }
  0xd4   :  { %v134_v33 = vmul.f32 20.0, %v801_v31  ;;  %v330_v34 = vld [vmem:[#allocation5 + $0x8] sm:$0xff]  ;;  %158 = vst.msk [vmem:[#allocation3 + $0x30] sm:$0xff] %vm135_vm0, %v904_v25  ;;  %159 = vst.msk [vmem:[#allocation3 + $0x38] sm:$0xff] %vm135_vm0, %v904_v25 }
  0xd5   :  { %142 = vst.msk [vmem:[#allocation5 + $0x30] sm:$0xff] %vm135_vm0, %v133_v32  ;;  %344 = vperm.xlu1 %765, %v330_v34   ;;  %v332_v36 = vld [vmem:[#allocation5 + $0x18] sm:$0xff]  ;;  %160 = vst.msk [vmem:[#allocation4] sm:$0xff] %vm135_vm0, %v904_v25  ;;  %v1069_v31 = vld [vmem:[#allocation2 + $0x8] sm:$0xff] }
  0xd6   :  { %143 = vst.msk [vmem:[#allocation5 + $0x38] sm:$0xff] %vm135_vm0, %v134_v33  ;;  %161 = vst.msk [vmem:[#allocation4 + $0x8] sm:$0xff] %vm135_vm0, %v904_v25 }
  0xd7   :  { %162 = vst.msk [vmem:[#allocation4 + $0x10] sm:$0xff] %vm135_vm0, %v904_v25  ;;  %163 = vst.msk [vmem:[#allocation4 + $0x18] sm:$0xff] %vm135_vm0, %v904_v25 }
  0xd8   :  { %v333_v37 = vld [vmem:[#allocation5 + $0x20] sm:$0xff]  ;;  %164 = vst.msk [vmem:[#allocation4 + $0x20] sm:$0xff] %vm135_vm0, %v904_v25  ;;  %165 = vst.msk [vmem:[#allocation4 + $0x28] sm:$0xff] %vm135_vm0, %v904_v25 }
  0xd9   :  { %349 = vperm.xlu1 %765, %v331_v35   ;;  %v334_v38 = vld [vmem:[#allocation5 + $0x28] sm:$0xff]  ;;  %166 = vst.msk [vmem:[#allocation4 + $0x30] sm:$0xff] %vm135_vm0, %v904_v25  ;;  %167 = vst.msk [vmem:[#allocation4 + $0x38] sm:$0xff] %vm135_vm0, %v904_v25  ;;  %v1079_v35 = vld [vmem:[#allocation2 + $0x10] sm:$0xff] }
  0xdc   :  { %v335_v39 = vld [vmem:[#allocation5 + $0x30] sm:$0xff] }
  0xdd   :  { %354 = vperm.xlu1 %765, %v332_v36   ;;  %v336_v40 = vld [vmem:[#allocation5 + $0x38] sm:$0xff] }
  0xe1   :  { %359 = vperm.xlu1 %765, %v333_v37  }
  0xe5   :  { %364 = vperm.xlu1 %765, %v334_v38  }
  0xe9   :  { %369 = vperm.xlu1 %765, %v335_v39   ;;  %v1089_v39 = vld [vmem:[#allocation2 + $0x18] sm:$0xff] }
  0xed   :  { %374 = vperm.xlu1 %765, %v336_v40  }
 0x11c   :  { %v298_v42 = vpop.f32.mrb[0].mxu0 }
 0x11d   :  { %v314_v43 = vpop.f32.mrb[0].mxu1  ;;  %v300_v44 = vpop.f32.mrb[1].mxu0 }
 0x11e   :  { %v316_v45 = vpop.f32.mrb[1].mxu1  ;;  %v301_v46 = vpop.f32.mrb[2].mxu0 }
 0x11f   :  { %v317_v47 = vpop.f32.mrb[2].mxu1  ;;  %v303_v48 = vpop.f32.mrb[3].mxu0 }
 0x120   :  { %v319_v49 = vpop.f32.mrb[3].mxu1 }
 0x124   :  { %v306_v50 = vpop.f32.mrb[4].mxu0 }
 0x125   :  { %v322_v51 = vpop.f32.mrb[4].mxu1  ;;  %v308_v52 = vpop.f32.mrb[5].mxu0 }
 0x126   :  { %v324_v53 = vpop.f32.mrb[5].mxu1  ;;  %v309_v54 = vpop.f32.mrb[6].mxu0 }
 0x127   :  { %v325_v55 = vpop.f32.mrb[6].mxu1  ;;  %v311_v56 = vpop.f32.mrb[7].mxu0 }
 0x128   :  { %v327_v57 = vpop.f32.mrb[7].mxu1 }
 0x150   :  { %v340_v59 = vpop.permute.xlu0 %339 }
 0x151   :  { %v377_v60 = vmul.f32 %v340_v59, %v298_v42 }
 0x153   :  { %v1016_v61 = vmul.f32 %v748_v58, %v377_v60 }
 0x154   :  { %v345_v62 = vpop.permute.xlu1 %344 }
 0x155   :  { %v378_v63 = vmul.f32 %v345_v62, %v301_v46  ;;  %v474_v0 = vsel %vm431_vm1, %v1016_v61, -inf }
 0x156   :  { %475 = vmax.xlane.f32.xlu1 %v474_v0 }
 0x157   :  { %v1020_v1 = vmul.f32 %v748_v58, %v378_v63 }
 0x158   :  { %v350_v3 = vpop.permute.xlu1 %349 }
 0x159   :  { %v379_v4 = vmul.f32 %v350_v3, %v306_v50  ;;  %v477_v5 = vsel %vm431_vm1, %v1020_v1, -inf }
 0x15a   :  { %478 = vmax.xlane.f32.xlu0 %v477_v5 }
 0x15b   :  { %v1024_v6 = vmul.f32 %v748_v58, %v379_v4 }
 0x15c   :  { %v355_v8 = vpop.permute.xlu1 %354 }
 0x15d   :  { %v380_v9 = vmul.f32 %v355_v8, %v309_v54  ;;  %v480_v10 = vsel %vm431_vm1, %v1024_v6, -inf }
 0x15e   :  { %481 = vmax.xlane.f32.xlu0 %v480_v10 }
 0x15f   :  { %v1028_v2 = vmul.f32 %v748_v58, %v380_v9 }
 0x160   :  { %v360_v7 = vpop.permute.xlu1 %359 }
 0x161   :  { %v381_v11 = vmul.f32 %v360_v7, %v314_v43  ;;  %v483_v12 = vsel %vm431_vm1, %v1028_v2, -inf  ;;  %v1099_v43 = vld [vmem:[#allocation2 + $0x20] sm:$0xff] }
 0x162   :  { %484 = vmax.xlane.f32.xlu1 %v483_v12 }
 0x163   :  { %v1032_v13 = vmul.f32 %v748_v58, %v381_v11 }
 0x164   :  { %v365_v14 = vpop.permute.xlu1 %364 }
 0x165   :  { %v382_v15 = vmul.f32 %v365_v14, %v317_v47  ;;  %v486_v16 = vsel %vm431_vm1, %v1032_v13, -inf  ;;  %v1109_v47 = vld [vmem:[#allocation2 + $0x28] sm:$0xff] }
 0x166   :  { %487 = vmax.xlane.f32.xlu0 %v486_v16 }
 0x167   :  { %v1036_v17 = vmul.f32 %v748_v58, %v382_v15 }
 0x168   :  { %v370_v18 = vpop.permute.xlu1 %369 }
 0x169   :  { %v383_v19 = vmul.f32 %v370_v18, %v322_v51  ;;  %v489_v20 = vsel %vm431_vm1, %v1036_v17, -inf  ;;  %v1119_v51 = vld [vmem:[#allocation2 + $0x30] sm:$0xff] }
 0x16a   :  { %490 = vmax.xlane.f32.xlu1 %v489_v20 }
 0x16b   :  { %v1040_v21 = vmul.f32 %v748_v58, %v383_v19 }
 0x16c   :  { %v375_v22 = vpop.permute.xlu1 %374 }
 0x16d   :  { %v384_v23 = vmul.f32 %v375_v22, %v325_v55  ;;  %v492_v24 = vsel %vm431_vm1, %v1040_v21, -inf  ;;  %v1129_v55 = vld [vmem:[#allocation2 + $0x38] sm:$0xff] }
 0x16e   :  { %493 = vmax.xlane.f32.xlu0 %v492_v24 }
 0x16f   :  { %v1060_v26 = vmul.f32 %v748_v58, %v384_v23 }
 0x171   :  { %v495_v27 = vsel %vm431_vm1, %v1060_v26, -inf }
 0x172   :  { %496 = vmax.xlane.f32.xlu1 %v495_v27 }
 0x1e3   :  { %v476_v29 = vpop.xlane.xlu1 %475 }
 0x1e4   :  { %v1067_v30 = vmax.f32 %v1064_v28, %v476_v29 }
 0x1e6   :  { %v506_v32 = vsub.f32 %v1064_v28, %v1067_v30  ;;  %651 = vst.msk [vmem:[#allocation2] sm:$0xff] %vm135_vm0, %v1067_v30  ;;  %548 = vperm.xlu0 %764, %v1067_v30  }
 0x1e7   :  { %v479_v33 = vpop.xlane.xlu0 %478 }
 0x1e8   :  { %v1077_v34 = vmax.f32 %v1069_v31, %v479_v33 }
 0x1ea   :  { %v507_v36 = vsub.f32 %v1069_v31, %v1077_v34  ;;  %652 = vst.msk [vmem:[#allocation2 + $0x8] sm:$0xff] %vm135_vm0, %v1077_v34  ;;  %553 = vperm.xlu1 %765, %v1077_v34   ;;  %v531_v34 = vld [vmem:[#allocation3 + $0x8] sm:$0xff] }
 0x1eb   :  { %v482_v37 = vpop.xlane.xlu0 %481 }
 0x1ec   :  { %v1087_v38 = vmax.f32 %v1079_v35, %v482_v37 }
 0x1ee   :  { %v508_v40 = vsub.f32 %v1079_v35, %v1087_v38  ;;  %653 = vst.msk [vmem:[#allocation2 + $0x10] sm:$0xff] %vm135_vm0, %v1087_v38  ;;  %558 = vperm.xlu1 %765, %v1087_v38  }
 0x1ef   :  { %v485_v41 = vpop.xlane.xlu1 %484 }
 0x1f0   :  { %v1097_v42 = vmax.f32 %v1089_v39, %v485_v41 }
 0x1f2   :  { %v509_v44 = vsub.f32 %v1089_v39, %v1097_v42  ;;  %654 = vst.msk [vmem:[#allocation2 + $0x18] sm:$0xff] %vm135_vm0, %v1097_v42  ;;  %563 = vperm.xlu0 %764, %v1097_v42   ;;  %v532_v42 = vld [vmem:[#allocation3 + $0x10] sm:$0xff] }
 0x1f3   :  { %v488_v45 = vpop.xlane.xlu0 %487 }
 0x1f4   :  { %v1107_v46 = vmax.f32 %v1099_v43, %v488_v45 }
 0x1f6   :  { %v510_v48 = vsub.f32 %v1099_v43, %v1107_v46  ;;  %655 = vst.msk [vmem:[#allocation2 + $0x20] sm:$0xff] %vm135_vm0, %v1107_v46  ;;  %568 = vperm.xlu1 %765, %v1107_v46  }
 0x1f7   :  { %v491_v49 = vpop.xlane.xlu1 %490 }
 0x1f8   :  { %v1117_v50 = vmax.f32 %v1109_v47, %v491_v49  ;;  %v522_v28 = vmul.f32 1.442695, %v510_v48 }
 0x1fa   :  { %v511_v52 = vsub.f32 %v1109_v47, %v1117_v50  ;;  %656 = vst.msk [vmem:[#allocation2 + $0x28] sm:$0xff] %vm135_vm0, %v1117_v50  ;;  %573 = vperm.xlu0 %764, %v1117_v50  }
 0x1fb   :  { %v494_v53 = vpop.xlane.xlu0 %493 }
 0x1fc   :  { %v1127_v54 = vmax.f32 %v1119_v51, %v494_v53  ;;  %v524_v35 = vmul.f32 1.442695, %v511_v52 }
 0x1fe   :  { %v512_v56 = vsub.f32 %v1119_v51, %v1127_v54  ;;  %657 = vst.msk [vmem:[#allocation2 + $0x30] sm:$0xff] %vm135_vm0, %v1127_v54  ;;  %578 = vperm.xlu1 %765, %v1127_v54  }
 0x1ff   :  { %v497_v57 = vpop.xlane.xlu1 %496 }
 0x200   :  { %v1137_v58 = vmax.f32 %v1129_v55, %v497_v57  ;;  %v404_v57 = vlaneseq  ;;  %v526_v43 = vmul.f32 1.442695, %v512_v56 }
 0x202   :  { %v513_v59 = vsub.f32 %v1129_v55, %v1137_v58  ;;  %658 = vst.msk [vmem:[#allocation2 + $0x38] sm:$0xff] %vm135_vm0, %v1137_v58  ;;  %583 = vperm.xlu0 %764, %v1137_v58  }
 0x204   :  { %v528_v50 = vmul.f32 1.442695, %v513_v59 }
 0x265   :  { %v549_v60 = vpop.permute.xlu0 %548 }
 0x266   :  { %v586_v62 = vsub.f32 %v1016_v61, %v549_v60 }
 0x268   :  { %v594_v63 = vmul.f32 1.442695, %v586_v62 }
 0x269   :  { %v554_v0 = vpop.permute.xlu1 %553 }
 0x26a   :  { %802 = vpow2.f32 %v594_v63  ;;  %v587_v3 = vsub.f32 %v1020_v1, %v554_v0  ;;  %v405_v0 = vshrl.u32 %v404_v57, 7 }
 0x26c   :  { %v596_v4 = vmul.f32 1.442695, %v587_v3  ;;  %v414_v3 = vand.u32 127, %v404_v57  ;;  %v530_v57 = vld [vmem:[#allocation3] sm:$0xff] }
 0x26d   :  { %v559_v5 = vpop.permute.xlu1 %558 }
 0x26e   :  { %804 = vpow2.f32 %v596_v4  ;;  %v588_v8 = vsub.f32 %v1024_v6, %v559_v5  ;;  %vm415_vm2 = vcmp.eq.s32.totalorder %v405_v0, %v414_v3 }
 0x270   :  { %v598_v9 = vmul.f32 1.442695, %v588_v8  ;;  %v407_v8 = vadd.s32 16, %v405_v0 }
 0x271   :  { %v564_v10 = vpop.permute.xlu0 %563 }
 0x272   :  { %806 = vpow2.f32 %v598_v9  ;;  %v589_v7 = vsub.f32 %v1028_v2, %v564_v10  ;;  %v406_v9 = vadd.s32 8, %v405_v0  ;;  %vm417_vm3 = vcmp.eq.s32.totalorder %v407_v8, %v414_v3  ;;  %v535_v8 = vld [vmem:[#allocation3 + $0x28] sm:$0xff] }
 0x274   :  { %v803_v11 = vpop.eup %802  ;;  %v600_v12 = vmul.f32 1.442695, %v589_v7  ;;  %vm416_vm4 = vcmp.eq.s32.totalorder %v406_v9, %v414_v3 }
 0x275   :  { %v569_v14 = vpop.permute.xlu1 %568  ;;  %v610_v15 = vsel %vm431_vm1, %v803_v11, 0.0  ;;  %v423_v11 = vsel %vm415_vm2, %v1016_v61, 0.0 }
 0x276   :  { %808 = vpow2.f32 %v600_v12  ;;  %v590_v16 = vsub.f32 %v1032_v13, %v569_v14  ;;  %611 = vadd.xlane.f32.xlu1 %v610_v15  ;;  %v409_v12 = vadd.s32 32, %v405_v0  ;;  %v408_v14 = vadd.s32 24, %v405_v0 }
 0x278   :  { %v805_v18 = vpop.eup %804  ;;  %v602_v19 = vmul.f32 1.442695, %v590_v16  ;;  %v432_v16 = vsel %vm431_vm1, %v423_v11, 0.0  ;;  %vm419_vm5 = vcmp.eq.s32.totalorder %v409_v12, %v414_v3  ;;  %vm418_vm6 = vcmp.eq.s32.totalorder %v408_v14, %v414_v3  ;;  %v536_v11 = vld [vmem:[#allocation3 + $0x30] sm:$0xff] }
 0x279   :  { %v574_v20 = vpop.permute.xlu0 %573  ;;  %v613_v22 = vsel %vm431_vm1, %v805_v18, 0.0 }
 0x27a   :  { %810 = vpow2.f32 %v602_v19  ;;  %v591_v23 = vsub.f32 %v1036_v17, %v574_v20  ;;  %614 = vadd.xlane.f32.xlu0 %v613_v22  ;;  %v425_v19 = vsel %vm417_vm3, %v1024_v6, 0.0  ;;  %v424_v20 = vsel %vm416_vm4, %v1020_v1, 0.0 }
 0x27b   :  { %v411_v22 = vadd.s32 48, %v405_v0  ;;  %v438_v61 = vsel %vm431_vm1, %v425_v19, 0.0  ;;  %v537_v19 = vld [vmem:[#allocation3 + $0x38] sm:$0xff] }
 0x27c   :  { %v807_v24 = vpop.eup %806  ;;  %v604_v25 = vmul.f32 1.442695, %v591_v23  ;;  %v410_v23 = vadd.s32 40, %v405_v0 }
 0x27d   :  { %v579_v27 = vpop.permute.xlu1 %578  ;;  %v616_v29 = vsel %vm431_vm1, %v807_v24, 0.0  ;;  %v435_v24 = vsel %vm431_vm1, %v424_v20, 0.0  ;;  %vm421_vm7 = vcmp.eq.s32.totalorder %v411_v22, %v414_v3 }
 0x27e   :  { %812 = vpow2.f32 %v604_v25  ;;  %v592_v33 = vsub.f32 %v1040_v21, %v579_v27  ;;  %617 = vadd.xlane.f32.xlu0 %v616_v29  ;;  %v427_v25 = vsel %vm419_vm5, %v1032_v13, 0.0  ;;  %v426_v27 = vsel %vm418_vm6, %v1028_v2, 0.0 }
 0x27f   :  { %vm420_vm8 = vcmp.eq.s32.totalorder %v410_v23, %v414_v3  ;;  %v412_v29 = vadd.s32 56, %v405_v0  ;;  %v444_v6 = vsel %vm431_vm1, %v427_v25, 0.0  ;;  %v441_v1 = vsel %vm431_vm1, %v426_v27, 0.0 }
 0x280   :  { %v809_v37 = vpop.eup %808  ;;  %v606_v41 = vmul.f32 1.442695, %v592_v33  ;;  %v429_v33 = vsel %vm421_vm7, %v1040_v21, 0.0  ;;  %v518_v21 = vmul.f32 1.442695, %v508_v40 }
 0x281   :  { %v584_v45 = vpop.permute.xlu0 %583  ;;  %v619_v49 = vsel %vm431_vm1, %v809_v37, 0.0  ;;  %v428_v37 = vsel %vm420_vm8, %v1036_v17, 0.0  ;;  %vm422_vm9 = vcmp.eq.s32.totalorder %v412_v29, %v414_v3  ;;  %v516_v17 = vmul.f32 1.442695, %v507_v36  ;;  %v534_v3 = vld [vmem:[#allocation3 + $0x20] sm:$0xff] }
 0x282   :  { %814 = vpow2.f32 %v606_v41  ;;  %v593_v53 = vsub.f32 %v1060_v26, %v584_v45  ;;  %620 = vadd.xlane.f32.xlu1 %v619_v49  ;;  %v450_v41 = vsel %vm431_vm1, %v429_v33, 0.0  ;;  %v447_v13 = vsel %vm431_vm1, %v428_v37, 0.0 }
 0x283   :  { %v430_v2 = vsel %vm422_vm9, %v1060_v26, 0.0  ;;  %v514_v49 = vmul.f32 1.442695, %v506_v32  ;;  %v520_v26 = vmul.f32 1.442695, %v509_v44 }
 0x284   :  { %v811_v60 = vpop.eup %810  ;;  %v608_v62 = vmul.f32 1.442695, %v593_v53  ;;  %v453_v45 = vsel %vm431_vm1, %v430_v2, 0.0  ;;  %v662_v2 = vld [vmem:[#allocation2] sm:$0xff] }
 0x285   :  { %v622_v63 = vsel %vm431_vm1, %v811_v60, 0.0 }
 0x286   :  { %816 = vpow2.f32 %v608_v62  ;;  %623 = vadd.xlane.f32.xlu0 %v622_v63  ;;  %v533_v62 = vld [vmem:[#allocation3 + $0x18] sm:$0xff] }
 0x287   :  { %818 = vpow2.f32 %v514_v49 }
 0x288   :  { %v813_v4 = vpop.eup %812  ;;  %820 = vpow2.f32 %v516_v17 }
 0x289   :  { %v625_v5 = vsel %vm431_vm1, %v813_v4, 0.0  ;;  %822 = vpow2.f32 %v518_v21 }
 0x28a   :  { %626 = vadd.xlane.f32.xlu1 %v625_v5  ;;  %824 = vpow2.f32 %v520_v26 }
 0x28b   :  { %826 = vpow2.f32 %v522_v28 }
 0x28c   :  { %v815_v10 = vpop.eup %814  ;;  %828 = vpow2.f32 %v524_v35 }
 0x28d   :  { %v628_v7 = vsel %vm431_vm1, %v815_v10, 0.0  ;;  %830 = vpow2.f32 %v526_v43 }
 0x28e   :  { %629 = vadd.xlane.f32.xlu0 %v628_v7  ;;  %832 = vpow2.f32 %v528_v50 }
 0x290   :  { %v817_v15 = vpop.eup %816 }
 0x291   :  { %v631_v18 = vsel %vm431_vm1, %v817_v15, 0.0  ;;  %v819_v53 = vpop.eup %818 }
 0x292   :  { %433 = vadd.xlane.f32.xlu0 %v432_v16  ;;  %632 = vadd.xlane.f32.xlu1 %v631_v18  ;;  %v538_v30 = vmul.f32 %v819_v53, %v530_v57  ;;  %v821_v31 = vpop.eup %820 }
 0x293   :  { %v539_v38 = vmul.f32 %v821_v31, %v531_v34  ;;  %v823_v39 = vpop.eup %822  ;;  %v663_v31 = vld [vmem:[#allocation2 + $0x8] sm:$0xff] }
 0x294   :  { %v540_v46 = vmul.f32 %v823_v39, %v532_v42  ;;  %v825_v48 = vpop.eup %824 }
 0x295   :  { %v541_v52 = vmul.f32 %v825_v48, %v533_v62  ;;  %v827_v63 = vpop.eup %826  ;;  %v665_v62 = vld [vmem:[#allocation2 + $0x18] sm:$0xff] }
 0x296   :  { %439 = vadd.xlane.f32.xlu0 %v438_v61  ;;  %436 = vadd.xlane.f32.xlu1 %v435_v24  ;;  %v542_v56 = vmul.f32 %v827_v63, %v534_v3  ;;  %v829_v4 = vpop.eup %828 }
 0x297   :  { %v543_v58 = vmul.f32 %v829_v4, %v535_v8  ;;  %v831_v59 = vpop.eup %830 }
 0x298   :  { %v544_v15 = vmul.f32 %v831_v59, %v536_v11  ;;  %v833_v16 = vpop.eup %832 }
 0x299   :  { %v545_v23 = vmul.f32 %v833_v16, %v537_v19 }
 0x29a   :  { %445 = vadd.xlane.f32.xlu0 %v444_v6  ;;  %442 = vadd.xlane.f32.xlu1 %v441_v1 }
 0x29e   :  { %451 = vadd.xlane.f32.xlu0 %v450_v41  ;;  %448 = vadd.xlane.f32.xlu1 %v447_v13 }
 0x2a2   :  { %454 = vadd.xlane.f32.xlu1 %v453_v45 }
 0x303   :  { %v612_v32 = vpop.xlane.xlu1 %611 }
 0x304   :  { %v634_v36 = vadd.f32 %v612_v32, %v538_v30 }
 0x306   :  { %643 = vst.msk [vmem:[#allocation3] sm:$0xff] %vm135_vm0, %v634_v36  ;;  %v664_v36 = vld [vmem:[#allocation2 + $0x10] sm:$0xff] }
 0x307   :  { %v615_v40 = vpop.xlane.xlu0 %614 }
 0x308   :  { %v635_v44 = vadd.f32 %v615_v40, %v539_v38 }
 0x30a   :  { %644 = vst.msk [vmem:[#allocation3 + $0x8] sm:$0xff] %vm135_vm0, %v635_v44 }
 0x30b   :  { %v618_v60 = vpop.xlane.xlu0 %617 }
 0x30c   :  { %v636_v47 = vadd.f32 %v618_v60, %v540_v46 }
 0x30d   :  { %v670_v54 = vld [vmem:[#allocation3] sm:$0xff] }
 0x30e   :  { %645 = vst.msk [vmem:[#allocation3 + $0x10] sm:$0xff] %vm135_vm0, %v636_v47  ;;  %834 = vlog2.f32 %v670_v54  ;;  %v666_v47 = vld [vmem:[#allocation2 + $0x20] sm:$0xff] }
 0x30f   :  { %v621_v0 = vpop.xlane.xlu1 %620 }
 0x310   :  { %v637_v51 = vadd.f32 %v621_v0, %v541_v52 }
 0x311   :  { %v671_v10 = vld [vmem:[#allocation3 + $0x8] sm:$0xff] }
 0x312   :  { %646 = vst.msk [vmem:[#allocation3 + $0x18] sm:$0xff] %vm135_vm0, %v637_v51  ;;  %836 = vlog2.f32 %v671_v10  ;;  %v668_v10 = vld [vmem:[#allocation2 + $0x30] sm:$0xff] }
 0x313   :  { %v624_v5 = vpop.xlane.xlu0 %623 }
 0x314   :  { %v638_v9 = vadd.f32 %v624_v5, %v542_v56  ;;  %v667_v5 = vld [vmem:[#allocation2 + $0x28] sm:$0xff] }
 0x315   :  { %v672_v55 = vld [vmem:[#allocation3 + $0x10] sm:$0xff] }
 0x316   :  { %647 = vst.msk [vmem:[#allocation3 + $0x20] sm:$0xff] %vm135_vm0, %v638_v9  ;;  %838 = vlog2.f32 %v672_v55 }
 0x317   :  { %v627_v7 = vpop.xlane.xlu1 %626 }
 0x318   :  { %v639_v12 = vadd.f32 %v627_v7, %v543_v58  ;;  %v835_v61 = vpop.eup %834 }
 0x319   :  { %v673_v14 = vld [vmem:[#allocation3 + $0x18] sm:$0xff]  ;;  %v679_v1 = vmul.f32 0.6931472, %v835_v61 }
 0x31a   :  { %648 = vst.msk [vmem:[#allocation3 + $0x28] sm:$0xff] %vm135_vm0, %v639_v12  ;;  %840 = vlog2.f32 %v673_v14 }
 0x31b   :  { %v630_v18 = vpop.xlane.xlu0 %629  ;;  %v694_v49 = vadd.f32 %v679_v1, %v662_v2 }
 0x31c   :  { %v640_v20 = vadd.f32 %v630_v18, %v544_v15  ;;  %v837_v6 = vpop.eup %836  ;;  %v669_v15 = vld [vmem:[#allocation2 + $0x38] sm:$0xff] }
 0x31d   :  { %v674_v22 = vld [vmem:[#allocation3 + $0x20] sm:$0xff]  ;;  %v681_v45 = vmul.f32 0.6931472, %v837_v6 }
 0x31e   :  { %842 = vlog2.f32 %v674_v22  ;;  %649 = vst.msk [vmem:[#allocation3 + $0x30] sm:$0xff] %vm135_vm0, %v640_v20 }
 0x31f   :  { %v633_v24 = vpop.xlane.xlu1 %632  ;;  %v434_v25 = vpop.xlane.xlu0 %433  ;;  %v695_v34 = vadd.f32 %v681_v45, %v663_v31 }
 0x320   :  { %v641_v27 = vadd.f32 %v633_v24, %v545_v23  ;;  %457 = vst.msk [vmem:[#allocation4] sm:$0xff] %vm135_vm0, %v434_v25  ;;  %v839_v33 = vpop.eup %838 }
 0x321   :  { %v675_v29 = vld [vmem:[#allocation3 + $0x28] sm:$0xff]  ;;  %v683_v17 = vmul.f32 0.6931472, %v839_v33 }
 0x322   :  { %844 = vlog2.f32 %v675_v29  ;;  %650 = vst.msk [vmem:[#allocation3 + $0x38] sm:$0xff] %vm135_vm0, %v641_v27 }
 0x323   :  { %v437_v37 = vpop.xlane.xlu1 %436  ;;  %v440_v41 = vpop.xlane.xlu0 %439  ;;  %v696_v35 = vadd.f32 %v683_v17, %v664_v36 }
 0x324   :  { %458 = vst.msk [vmem:[#allocation4 + $0x8] sm:$0xff] %vm135_vm0, %v437_v37  ;;  %459 = vst.msk [vmem:[#allocation4 + $0x10] sm:$0xff] %vm135_vm0, %v440_v41  ;;  %v841_v21 = vpop.eup %840 }
 0x325   :  { %v676_v13 = vld [vmem:[#allocation3 + $0x30] sm:$0xff]  ;;  %v685_v38 = vmul.f32 0.6931472, %v841_v21 }
 0x326   :  { %846 = vlog2.f32 %v676_v13 }
 0x327   :  { %v702_v26 = vld [vmem:[#allocation4] sm:$0xff]  ;;  %v443_v53 = vpop.xlane.xlu1 %442  ;;  %v446_v57 = vpop.xlane.xlu0 %445  ;;  %v697_v50 = vadd.f32 %v685_v38, %v665_v62 }
 0x328   :  { %v843_v28 = vpop.eup %842  ;;  %v710_v30 = vsub.f32 %v694_v49, %v702_v26  ;;  %460 = vst.msk [vmem:[#allocation4 + $0x18] sm:$0xff] %vm135_vm0, %v443_v53  ;;  %461 = vst.msk [vmem:[#allocation4 + $0x20] sm:$0xff] %vm135_vm0, %v446_v57 }
 0x329   :  { %v677_v32 = vld [vmem:[#allocation3 + $0x38] sm:$0xff]  ;;  %v687_v39 = vmul.f32 0.6931472, %v843_v28 }
 0x32a   :  { %848 = vlog2.f32 %v677_v32  ;;  %718 = vst.msk [vmem:[%s1251_s3] sm:$0xff] %vm135_vm0, %v710_v30 }
 0x32b   :  { %v703_v40 = vld [vmem:[#allocation4 + $0x8] sm:$0xff]  ;;  %v704_v42 = vld [vmem:[#allocation4 + $0x10] sm:$0xff]  ;;  %v449_v44 = vpop.xlane.xlu1 %448  ;;  %v452_v43 = vpop.xlane.xlu0 %451  ;;  %v698_v52 = vadd.f32 %v687_v39, %v666_v47 }
 0x32c   :  { %v845_v46 = vpop.eup %844  ;;  %v711_v48 = vsub.f32 %v695_v34, %v703_v40  ;;  %v712_v60 = vsub.f32 %v696_v35, %v704_v42  ;;  %462 = vst.msk [vmem:[#allocation4 + $0x28] sm:$0xff] %vm135_vm0, %v449_v44  ;;  %463 = vst.msk [vmem:[#allocation4 + $0x30] sm:$0xff] %vm135_vm0, %v452_v43 }
 0x32d   :  { %v689_v63 = vmul.f32 0.6931472, %v845_v46 }
 0x32e   :  { %719 = vst.msk [vmem:[%s1251_s3 + $0x8] sm:$0xff] %vm135_vm0, %v711_v48  ;;  %720 = vst.msk [vmem:[%s1251_s3 + $0x10] sm:$0xff] %vm135_vm0, %v712_v60 }
 0x32f   :  { %v705_v0 = vld [vmem:[#allocation4 + $0x18] sm:$0xff]  ;;  %v706_v3 = vld [vmem:[#allocation4 + $0x20] sm:$0xff]  ;;  %v455_v51 = vpop.xlane.xlu1 %454  ;;  %v699_v9 = vadd.f32 %v689_v63, %v667_v5 }
 0x330   :  { %v847_v54 = vpop.eup %846  ;;  %v713_v56 = vsub.f32 %v697_v50, %v705_v0  ;;  %v714_v4 = vsub.f32 %v698_v52, %v706_v3  ;;  %464 = vst.msk [vmem:[#allocation4 + $0x38] sm:$0xff] %vm135_vm0, %v455_v51 }
 0x331   :  { %v691_v8 = vmul.f32 0.6931472, %v847_v54 }
 0x332   :  { %721 = vst.msk [vmem:[%s1251_s3 + $0x18] sm:$0xff] %vm135_vm0, %v713_v56  ;;  %722 = vst.msk [vmem:[%s1251_s3 + $0x20] sm:$0xff] %vm135_vm0, %v714_v4 }
 0x333   :  { %v707_v55 = vld [vmem:[#allocation4 + $0x28] sm:$0xff]  ;;  %v700_v58 = vadd.f32 %v691_v8, %v668_v10  ;;  %v708_v59 = vld [vmem:[#allocation4 + $0x30] sm:$0xff] }
 0x334   :  { %v849_v7 = vpop.eup %848  ;;  %v715_v11 = vsub.f32 %v699_v9, %v707_v55 }
 0x335   :  { %v716_v12 = vsub.f32 %v700_v58, %v708_v59  ;;  %v693_v14 = vmul.f32 0.6931472, %v849_v7 }
 0x336   :  { %723 = vst.msk [vmem:[%s1251_s3 + $0x28] sm:$0xff] %vm135_vm0, %v715_v11 }
 0x337   :  { %724 = vst.msk [vmem:[%s1251_s3 + $0x30] sm:$0xff] %vm135_vm0, %v716_v12  ;;  %v701_v16 = vadd.f32 %v693_v14, %v669_v15  ;;  %v709_v18 = vld [vmem:[#allocation4 + $0x38] sm:$0xff] }
 0x339   :  { %v717_v19 = vsub.f32 %v701_v16, %v709_v18 }
 0x33b   :  { %725 = vst.msk [vmem:[%s1251_s3 + $0x38] sm:$0xff] %vm135_vm0, %v717_v19 }
 0x33c   :  { %730 = vsyncpa [#allocation7], 1 }
 0x33d   :  { %731 = vsyncpa [#allocation9], 1 }

</bundles_post_ra>
